<compile_context>
chip_gen: v7x
topology: tpu7x:2x2x1
jax: 0.10.0
libtpu: 0.0.40
codegen_flags: <defaults>
</compile_context>

<pallas_src>
import functools

import jax
import jax.numpy as jnp
from jax.experimental import pallas as pl
from jax.experimental.pallas import tpu as pltpu


def _moving_avg_kernel(x_ref, o_ref, *, kernel_size, pad):
    """x_ref: (bt, L, C) native-layout tile; o_ref: (bt, l_full, C) where
    l_full = L + 2*pad - kernel_size + 1 (all stride-1 window positions)."""
    k = kernel_size
    x = x_ref[...].astype(jnp.float32)                    # f32 accumulation
    bt, L, C = x.shape
    l_pad = L + 2 * pad
    l_full = l_pad - k + 1

    # --- replicate padding in-kernel (VMEM only, no padded copy through HBM) --
    if pad > 0:
        front = jnp.broadcast_to(x[:, 0:1, :], (bt, pad, C))
        back = jnp.broadcast_to(x[:, L - 1:L, :], (bt, pad, C))
        xp = jnp.concatenate([front, x, back], axis=1)     # (bt, l_pad, C)
    else:
        xp = x

    # --- exact sliding-window sums via doubling shifts -----------------------
    # sums[m][:, i, :] = sum_{j<m} xp[:, i+j, :]; built with ceil(log2 k) adds,
    # then combined along the binary decomposition of k (popcount(k)-1 adds).
    # No running prefix sum -> no cancellation error growth with L.
    if k == 1:
        win = xp
    else:
        sums = {1: xp}
        m = 1
        while m * 2 <= k:
            s = sums[m]
            n = s.shape[1] - m
            sums[m * 2] = s[:, :n, :] + s[:, m:, :]
            m *= 2
        win = None
        off, rem, b = 0, k, m
        while b >= 1:
            if rem >= b:
                piece = sums[b][:, off:off + l_full, :]
                win = piece if win is None else win + piece
                off += b
                rem -= b
            b //= 2
    # TODO(synk): when used inside series_decomp (DLinear), emit the residual
    # x - mean as a second output here to save the downstream HBM re-read of x.

    o_ref[...] = (win * (1.0 / k)).astype(o_ref.dtype)


def _vmem_budget_bytes():
    """Generation-aware per-grid-step VMEM budget (v5e/v6e: 128 MiB physical,
    v7x: only 64 MiB), kept conservative so the scoped limit is never tight."""
    try:
        phys = pltpu.get_tpu_info().vmem_capacity_bytes
    except Exception:
        phys = 64 * 1024 * 1024
    return min(24 * 1024 * 1024, phys // 4), min(phys // 2, 56 * 1024 * 1024)


def _pick_batch_tile(B, L, l_full, l_pad, C, itemsize, kernel_size, budget):
    """Largest batch tile such that (a) the per-grid-step footprint
    (double-buffered in/out blocks + live f32 temporaries, including the
    128-lane padding of the channel dim) stays under `budget`, and (b) the grid
    has >= 2 steps whenever B >= 2 (feeds both v7x TensorCores and lets the
    BlockSpec pipeline overlap DMA with compute)."""
    def r8(n):
        return ((n + 7) // 8) * 8

    lanes = ((C + 127) // 128) * 128            # VMEM pads the lane dim to 128
    n_temps = 3 + max(1, kernel_size.bit_length())
    per_item = (2 * (r8(L) + r8(l_full)) * itemsize
                + n_temps * r8(l_pad) * 4) * lanes
    bt = max(1, min(B, budget // max(per_item, 1)))
    # TODO(synk): halo-tile the time axis when even bt == 1 exceeds the budget
    # (extremely long L); at DLinear-scale L a single full-L block always fits.
    if B >= 2:
        bt = min(bt, (B + 1) // 2)              # guarantee >= 2 grid steps
    while bt > 1 and B % bt:                    # avoid padded tail blocks
        bt -= 1
    return bt


def moving_avg(x, kernel_size, stride):
    """Pallas implementation of MovingAvg.forward.  x: [B, L, C]."""
    B, L, C = x.shape
    pad = (kernel_size - 1) // 2
    l_pad = L + 2 * pad
    l_full = l_pad - kernel_size + 1            # stride-1 window positions
    l_out = (l_pad - kernel_size) // stride + 1

    budget, vmem_limit = _vmem_budget_bytes()
    bt = _pick_batch_tile(B, L, l_full, l_pad, C, x.dtype.itemsize,
                          kernel_size, budget)
    grid = (B // bt,)                           # bt divides B

    kernel = functools.partial(_moving_avg_kernel,
                               kernel_size=kernel_size, pad=pad)
    out = pl.pallas_call(
        kernel,
        out_shape=jax.ShapeDtypeStruct((B, l_full, C), x.dtype),
        grid=grid,
        in_specs=[pl.BlockSpec((bt, L, C), lambda b: (b, 0, 0))],
        out_specs=pl.BlockSpec((bt, l_full, C), lambda b: (b, 0, 0)),
        compiler_params=pltpu.CompilerParams(
            dimension_semantics=("parallel",),
            vmem_limit_bytes=vmem_limit,
        ),
    )(x)

    if stride > 1:
        # TODO(synk): fold the stride downselect into the kernel so only l_out
        # rows are written to HBM; the canonical DLinear config uses stride == 1,
        # which takes this branch never and incurs no extra pass.
        out = out[:, ::stride, :]
    assert out.shape == (B, l_out, C)
    return out


def _reference_moving_avg(x, kernel_size, stride):
    """Pure-JAX reference mirroring the PyTorch module exactly (f32 math)."""
    pad = (kernel_size - 1) // 2
    if pad > 0:
        front = jnp.repeat(x[:, 0:1, :], pad, axis=1)
        end = jnp.repeat(x[:, -1:, :], pad, axis=1)
        xp = jnp.concatenate([front, x, end], axis=1)       # [B, L_pad, C]
    else:
        xp = x
    l_pad = xp.shape[1]
    l_out = (l_pad - kernel_size) // stride + 1
    windows = jnp.stack(
        [xp[:, t * stride:t * stride + kernel_size, :] for t in range(l_out)],
        axis=1,
    )                                                        # [B, L_out, k, C]
    return jnp.mean(windows, axis=2)


if __name__ == "__main__":
    key = jax.random.PRNGKey(0)
    # (kernel_size, stride, B, L, C, dtype): canonical DLinear k=25, small odd
    # and even k, the k=1 edge case, a stride>1 case, and a bf16 case.
    configs = [
        (25, 1, 2, 32, 8, jnp.float32),
        (5, 1, 3, 16, 7, jnp.float32),
        (4, 1, 2, 16, 7, jnp.float32),
        (1, 1, 2, 16, 4, jnp.float32),
        (7, 2, 2, 19, 5, jnp.float32),
        (25, 1, 2, 32, 8, jnp.bfloat16),
    ]
    for ks, stride, B, L, C, dt in configs:
        key, sub = jax.random.split(key)
        x = jax.random.normal(sub, (B, L, C), dtype=jnp.float32).astype(dt)
        out = jax.block_until_ready(moving_avg(x, ks, stride))
        ref = _reference_moving_avg(x.astype(jnp.float32), ks, stride)
        assert out.shape == ref.shape, (ks, out.shape, ref.shape)
        tol = 1e-5 if dt == jnp.float32 else 2e-2
        assert jnp.allclose(out.astype(jnp.float32), ref, atol=tol, rtol=tol), \
            f"mismatch k={ks} stride={stride} dtype={dt}"
    print("KERNEL_OK")
</pallas_src>

<mosaic_0001>
module attributes {stable_mosaic.version = 11 : i64} {
  func.func @_moving_avg_kernel(%arg0: i32, %arg1: memref<1x32x8xf32, #tpu.memory_space<vmem>>, %arg2: memref<1x32x8xf32, #tpu.memory_space<vmem>>) attributes {dimension_semantics = [#tpu.dimension_semantics<parallel>], iteration_bounds = array<i64: 2>, scalar_prefetch = 0 : i64, scratch_operands = 0 : i64, tpu.core_type = #tpu.core_type<tc>, window_params = [{transform_indices = @transform_0, window_bounds = array<i64: 1, 32, 8>}, {transform_indices = @transform_1, window_bounds = array<i64: 1, 32, 8>}]} {
    %c0 = arith.constant 0 : index
    %c0_0 = arith.constant 0 : index
    %c0_1 = arith.constant 0 : index
    %0 = vector.load %arg1[%c0, %c0_0, %c0_1] : memref<1x32x8xf32, #tpu.memory_space<vmem>>, vector<1x32x8xf32>
    %1 = vector.extract_strided_slice %0 {offsets = [0, 0, 0], sizes = [1, 1, 8], strides = [1, 1, 1]} : vector<1x32x8xf32> to vector<1x1x8xf32>
    %2 = vector.shape_cast %1 : vector<1x1x8xf32> to vector<1x1x8xf32>
    %3 = vector.broadcast %2 : vector<1x1x8xf32> to vector<1x12x8xf32>
    %4 = vector.extract_strided_slice %0 {offsets = [0, 31, 0], sizes = [1, 1, 8], strides = [1, 1, 1]} : vector<1x32x8xf32> to vector<1x1x8xf32>
    %5 = vector.shape_cast %4 : vector<1x1x8xf32> to vector<1x1x8xf32>
    %6 = vector.broadcast %5 : vector<1x1x8xf32> to vector<1x12x8xf32>
    %7 = tpu.concatenate %3, %0, %6 in 1 : vector<1x12x8xf32>, vector<1x32x8xf32>, vector<1x12x8xf32> -> vector<1x56x8xf32>
    %8 = vector.extract_strided_slice %7 {offsets = [0, 0, 0], sizes = [1, 55, 8], strides = [1, 1, 1]} : vector<1x56x8xf32> to vector<1x55x8xf32>
    %9 = vector.extract_strided_slice %7 {offsets = [0, 1, 0], sizes = [1, 55, 8], strides = [1, 1, 1]} : vector<1x56x8xf32> to vector<1x55x8xf32>
    %10 = arith.addf %8, %9 : vector<1x55x8xf32>
    %11 = vector.extract_strided_slice %10 {offsets = [0, 0, 0], sizes = [1, 53, 8], strides = [1, 1, 1]} : vector<1x55x8xf32> to vector<1x53x8xf32>
    %12 = vector.extract_strided_slice %10 {offsets = [0, 2, 0], sizes = [1, 53, 8], strides = [1, 1, 1]} : vector<1x55x8xf32> to vector<1x53x8xf32>
    %13 = arith.addf %11, %12 : vector<1x53x8xf32>
    %14 = vector.extract_strided_slice %13 {offsets = [0, 0, 0], sizes = [1, 49, 8], strides = [1, 1, 1]} : vector<1x53x8xf32> to vector<1x49x8xf32>
    %15 = vector.extract_strided_slice %13 {offsets = [0, 4, 0], sizes = [1, 49, 8], strides = [1, 1, 1]} : vector<1x53x8xf32> to vector<1x49x8xf32>
    %16 = arith.addf %14, %15 : vector<1x49x8xf32>
    %17 = vector.extract_strided_slice %16 {offsets = [0, 0, 0], sizes = [1, 41, 8], strides = [1, 1, 1]} : vector<1x49x8xf32> to vector<1x41x8xf32>
    %18 = vector.extract_strided_slice %16 {offsets = [0, 8, 0], sizes = [1, 41, 8], strides = [1, 1, 1]} : vector<1x49x8xf32> to vector<1x41x8xf32>
    %19 = arith.addf %17, %18 : vector<1x41x8xf32>
    %20 = vector.extract_strided_slice %19 {offsets = [0, 0, 0], sizes = [1, 32, 8], strides = [1, 1, 1]} : vector<1x41x8xf32> to vector<1x32x8xf32>
    %21 = vector.extract_strided_slice %16 {offsets = [0, 16, 0], sizes = [1, 32, 8], strides = [1, 1, 1]} : vector<1x49x8xf32> to vector<1x32x8xf32>
    %22 = arith.addf %20, %21 : vector<1x32x8xf32>
    %23 = vector.extract_strided_slice %7 {offsets = [0, 24, 0], sizes = [1, 32, 8], strides = [1, 1, 1]} : vector<1x56x8xf32> to vector<1x32x8xf32>
    %24 = arith.addf %22, %23 : vector<1x32x8xf32>
    %cst = arith.constant 4.000000e-02 : f32
    %25 = vector.broadcast %cst : f32 to vector<1x32x8xf32>
    %26 = arith.mulf %24, %25 : vector<1x32x8xf32>
    %c0_2 = arith.constant 0 : index
    %c0_3 = arith.constant 0 : index
    %c0_4 = arith.constant 0 : index
    %27 = vector.load %arg2[%c0_2, %c0_3, %c0_4] : memref<1x32x8xf32, #tpu.memory_space<vmem>>, vector<1x32x8xf32>
    tpu.vector_store %arg2[%c0_2, %c0_3, %c0_4], %26 {strides = array<i32>} : memref<1x32x8xf32, #tpu.memory_space<vmem>>, vector<1x32x8xf32>,
    return
  }
  func.func @transform_0(%arg0: i32) -> (i32, i32, i32) {
    %c0_i32 = arith.constant 0 : i32
    %c0_i32_0 = arith.constant 0 : i32
    %c0_i32_1 = arith.constant 0 : i32
    return %arg0, %c0_i32, %c0_i32_0 : i32, i32, i32
  }
  func.func @transform_1(%arg0: i32) -> (i32, i32, i32) {
    %c0_i32 = arith.constant 0 : i32
    %c0_i32_0 = arith.constant 0 : i32
    %c0_i32_1 = arith.constant 0 : i32
    return %arg0, %c0_i32, %c0_i32_0 : i32, i32, i32
  }
}

</mosaic_0001>

<bundles_post_ra>
// kernel: tpu_custom_call.1
= control target key start
LH: loop header
LB: loop body
LE: loop exit
PB: predicated region body
PF: predicated region fallthrough
CT: control target
= control target key end

     0   :  { %s362_s6 = smov 0   ;;  %s430_s0 = inlined_call_operand.vmem [shape: f32[2,32,8], index: 0, kind: input, shape index: {}]   ;;  %s431_s1 = inlined_call_operand.vmem [shape: f32[2,32,8], index: 1, kind: output, shape index: {}]  }
   0x1 LB: > { %s323_s7 = sadd.s32 4294967295, %s350_s6   ;;  %p327_p0 = scmp.ge.s32.totalorder %s350_s6, 1  ;;  %s350_s6 = sphi %s362_s6, %s11_s6  }
   0x2   : > { %p87_p1 = scmp.lt.s32.totalorder %s350_s6, 3 }
   0x4   : > { %p88_p2 = pnand %p327_p0, %p87_p1 }
   0x5   : > { %p107_p3 = scmp.lt.s32.totalorder (!%p88_p2), %s323_s7, 1  ;;  %v121_v0 = vlaneseq (!%p88_p2)  ;;  %vm134_vm0 = vcmask (!%p88_p2), 1043456   ;;  %vm152_vm1 = vcmask (!%p88_p2), 1046528   ;;  %vm187_vm2 = vcmask (!%p88_p2), 1045504  }
   0x6   : > { %91 = sbr.rel (%p88_p2) target bundleno = 48 (0x30), region = 24  ;;  %vm263_vm3 = vcmask (!%p88_p2), 64512  }
   0x7   : > { %v122_v1 = vshrl.u32 (!%p88_p2), %v121_v0, 7 }
   0x9   : > { %v123_v2 = vsub.s32 (!%p88_p2), 0, %v122_v1  ;;  %v127_v3 = vsub.s32 (!%p88_p2), 7, %v122_v1 }
   0xd   : > { %s433_s7 = smov (!%p107_p3, %s323_s7), 1 }
   0xe   : > { %s334_s8 = sshll.u32 %s433_s7, 5 }
   0xf   : > { %s111_s11 = scalar_lea.vmem %s430_s0, %s334_s8  ;;  %s116_s14 = scalar_lea.vmem %s431_s1, %s334_s8 }
  0x10   : > { %v117_v4 = vld [vmem:[%s111_s11] sm:$0xff]  ;;  %v118_v5 = vld [vmem:[%s111_s11 + $0x8] sm:$0xff]  ;;  %v119_v6 = vld [vmem:[%s111_s11 + $0x10] sm:$0xff] }
  0x11   : > { %v120_v7 = vld [vmem:[%s111_s11 + $0x18] sm:$0xff]  ;;  %v124_v8 = vrot.slane %v117_v4, %v123_v2  ;;  %v135_v9 = vrot.slane %v117_v4, 4  ;;  %v136_v10 = vrot.slane %v118_v5, 4  ;;  %v138_v11 = vrot.slane %v119_v6, 4 }
  0x12   : > { %v378_v12 = vrot.slane %v120_v7, %v127_v3  ;;  %v140_v13 = vrot.slane %v120_v7, 4 }
  0x13   : > { %v137_v14 = vsel %vm134_vm0, %v135_v9, %v136_v10  ;;  %v382_v15 = vsel %vm134_vm0, %v136_v10, %v138_v11  ;;  %v148_v16 = vsel %vm134_vm0, %v124_v8, %v135_v9  ;;  %v153_v17 = vrot.slane %v124_v8, 1 }
  0x14   : > { %v386_v18 = vsel %vm134_vm0, %v138_v11, %v140_v13  ;;  %v390_v19 = vsel %vm134_vm0, %v140_v13, %v378_v12  ;;  %v154_v20 = vrot.slane %v148_v16, 1  ;;  %v156_v21 = vrot.slane %v137_v14, 1 }
  0x15   : > { %v158_v22 = vrot.slane %v382_v15, 1  ;;  %v160_v23 = vrot.slane %v386_v18, 1  ;;  %v162_v24 = vrot.slane %v390_v19, 1  ;;  %v164_v25 = vrot.slane %v378_v12, 1 }
  0x16   : > { %v155_v26 = vsel %vm152_vm1, %v153_v17, %v154_v20  ;;  %v157_v27 = vsel %vm152_vm1, %v154_v20, %v156_v21 }
  0x17   : > { %v159_v28 = vsel %vm152_vm1, %v156_v21, %v158_v22  ;;  %v161_v29 = vsel %vm152_vm1, %v158_v22, %v160_v23  ;;  %v163_v30 = vsel %vm152_vm1, %v160_v23, %v162_v24  ;;  %v165_v31 = vsel %vm152_vm1, %v162_v24, %v164_v25 }
  0x18   : > { %v173_v32 = vadd.f32 %v155_v26, %v124_v8  ;;  %v174_v33 = vadd.f32 %v157_v27, %v148_v16  ;;  %v175_v34 = vadd.f32 %v159_v28, %v137_v14  ;;  %v176_v35 = vadd.f32 %v161_v29, %v382_v15 }
  0x19   : > { %v177_v36 = vadd.f32 %v163_v30, %v386_v18  ;;  %v178_v37 = vadd.f32 %v165_v31, %v390_v19  ;;  %v179_v38 = vadd.f32 %v164_v25, %v378_v12 }
  0x1a   : > { %v188_v39 = vrot.slane %v173_v32, 2  ;;  %v189_v40 = vrot.slane %v174_v33, 2  ;;  %v191_v41 = vrot.slane %v175_v34, 2  ;;  %v193_v42 = vrot.slane %v176_v35, 2 }
  0x1b   : > { %v195_v43 = vrot.slane %v177_v36, 2  ;;  %v197_v44 = vrot.slane %v178_v37, 2  ;;  %v199_v45 = vrot.slane %v179_v38, 2 }
  0x1c   : > { %v190_v46 = vsel %vm187_vm2, %v188_v39, %v189_v40  ;;  %v192_v47 = vsel %vm187_vm2, %v189_v40, %v191_v41  ;;  %v194_v48 = vsel %vm187_vm2, %v191_v41, %v193_v42 }
  0x1d   : > { %v196_v49 = vsel %vm187_vm2, %v193_v42, %v195_v43  ;;  %v208_v50 = vadd.f32 %v190_v46, %v173_v32  ;;  %v209_v51 = vadd.f32 %v192_v47, %v174_v33  ;;  %v210_v52 = vadd.f32 %v194_v48, %v175_v34 }
  0x1e   : > { %v211_v53 = vadd.f32 %v196_v49, %v176_v35  ;;  %v198_v54 = vsel %vm187_vm2, %v195_v43, %v197_v44  ;;  %v200_v55 = vsel %vm187_vm2, %v197_v44, %v199_v45  ;;  %v214_v56 = vadd.f32 %v199_v45, %v179_v38 }
  0x1f   : > { %v222_v57 = vrot.slane %v208_v50, 4  ;;  %v223_v58 = vrot.slane %v209_v51, 4  ;;  %v225_v59 = vrot.slane %v210_v52, 4  ;;  %v212_v60 = vadd.f32 %v198_v54, %v177_v36 }
  0x20   : > { %v227_v61 = vrot.slane %v211_v53, 4  ;;  %v213_v62 = vadd.f32 %v200_v55, %v178_v37  ;;  %v233_v63 = vrot.slane %v214_v56, 4 }
  0x21   : > { %v224_v0 = vsel %vm134_vm0, %v222_v57, %v223_v58  ;;  %v226_v1 = vsel %vm134_vm0, %v223_v58, %v225_v59  ;;  %v229_v2 = vrot.slane %v212_v60, 4 }
  0x22   : > { %v228_v3 = vsel %vm134_vm0, %v225_v59, %v227_v61  ;;  %v241_v4 = vadd.f32 %v224_v0, %v208_v50  ;;  %v242_v5 = vadd.f32 %v226_v1, %v209_v51  ;;  %v231_v6 = vrot.slane %v213_v62, 4 }
  0x23   : > { %v243_v7 = vadd.f32 %v228_v3, %v210_v52  ;;  %v230_v8 = vsel %vm134_vm0, %v227_v61, %v229_v2 }
  0x24   : > { %v247_v9 = vadd.f32 %v242_v5, %v241_v4  ;;  %v244_v10 = vadd.f32 %v230_v8, %v211_v53  ;;  %v232_v11 = vsel %vm134_vm0, %v229_v2, %v231_v6  ;;  %v234_v13 = vsel %vm134_vm0, %v231_v6, %v233_v63 }
  0x25   : > { %v248_v14 = vadd.f32 %v243_v7, %v242_v5  ;;  %v245_v16 = vadd.f32 %v232_v11, %v212_v60  ;;  %v246_v17 = vadd.f32 %v234_v13, %v213_v62 }
  0x26   : > { %v251_v20 = vadd.f32 %v247_v9, %v243_v7  ;;  %v249_v21 = vadd.f32 %v244_v10, %v243_v7 }
  0x27   : > { %v252_v22 = vadd.f32 %v248_v14, %v244_v10  ;;  %v250_v23 = vadd.f32 %v245_v16, %v244_v10 }
  0x28   : > { %v255_v24 = vadd.f32 %v251_v20, %v382_v15  ;;  %v253_v25 = vadd.f32 %v249_v21, %v245_v16 }
  0x29   : > { %v256_v26 = vadd.f32 %v252_v22, %v386_v18  ;;  %v254_v27 = vadd.f32 %v250_v23, %v246_v17 }
  0x2a   : > { %v259_v28 = vmul.f32 0.04, %v255_v24  ;;  %v257_v29 = vadd.f32 %v253_v25, %v390_v19 }
  0x2b   : > { %v260_v30 = vmul.f32 0.04, %v256_v26  ;;  %v258_v31 = vadd.f32 %v254_v27, %v378_v12 }
  0x2c   : > { %264 = vst.msk [vmem:[%s116_s14] sm:$0xff] %vm263_vm3, %v259_v28  ;;  %v261_v32 = vmul.f32 0.04, %v257_v29 }
  0x2d   : > { %265 = vst.msk [vmem:[%s116_s14 + $0x8] sm:$0xff] %vm263_vm3, %v260_v30  ;;  %v262_v15 = vmul.f32 0.04, %v258_v31 }
  0x2e   : > { %266 = vst.msk [vmem:[%s116_s14 + $0x10] sm:$0xff] %vm263_vm3, %v261_v32 }
  0x2f   : > { %267 = vst.msk [vmem:[%s116_s14 + $0x18] sm:$0xff] %vm263_vm3, %v262_v15 }
  0x30 PF: > { %s11_s6 = sadd.s32 1, %s350_s6  }
  0x31   : > { %p8_p4 = scmp.ge.s32.totalorder %s11_s6, 4  }
  0x33   :  { %10 = sbr.rel (!%p8_p4) target bundleno = 1 (0x1), region = 54 }

</bundles_post_ra>
